<compile_context>
chip_gen: v7x
topology: tpu7x:2x2x1
jax: 0.10.0
libtpu: 0.0.40
codegen_flags: <defaults>
</compile_context>

<pallas_src>
import functools

import jax
import jax.numpy as jnp
from jax.experimental import pallas as pl
from jax.experimental.pallas import tpu as pltpu


# ---------------------------------------------------------------------------
# Kernel 1: embeddings -- token row gather (scalar-prefetched ids) + positional
# ---------------------------------------------------------------------------
def _embed_kernel(ids_ref, tok_row_ref, pos_row_ref, o_ref):
    del ids_ref  # consumed only by the index_maps
    o_ref[...] = (tok_row_ref[...] + pos_row_ref[...]).astype(o_ref.dtype)


def _embed(input_ids, tok_emb, pos_emb):
    B, S = input_ids.shape
    V, H = tok_emb.shape
    flat_ids = input_ids.reshape(B * S).astype(jnp.int32)
    # Leading axis is the gather axis; last two dims of every block equal the
    # full array dims, so the (8,128) block constraint is trivially satisfied.
    tok3 = tok_emb.reshape(V, 1, H)
    pos3 = pos_emb.reshape(S, 1, H)
    out = pl.pallas_call(
        _embed_kernel,
        out_shape=jax.ShapeDtypeStruct((B * S, 1, H), tok_emb.dtype),
        grid_spec=pltpu.PrefetchScalarGridSpec(
            num_scalar_prefetch=1,
            grid=(B * S,),
            in_specs=[
                # token table row selected by the prefetched id -> DMA gather
                pl.BlockSpec((None, 1, H), lambda i, ids: (ids[i], 0, 0)),
                # positional row s = i % S
                pl.BlockSpec((None, 1, H), lambda i, ids: (i % S, 0, 0)),
            ],
            out_specs=pl.BlockSpec((None, 1, H), lambda i, ids: (i, 0, 0)),
        ),
        compiler_params=pltpu.CompilerParams(dimension_semantics=("arbitrary",)),
    )(flat_ids, tok3, pos3)
    return out.reshape(B, S, H)


# ---------------------------------------------------------------------------
# Kernel 2: fused encoder stack (all layers; activation VMEM-resident over L)
# ---------------------------------------------------------------------------
def _encoder_kernel(x_emb_ref, mask_ref, wqkv_ref, bqkv_ref, wo_ref, bo_ref,
                    g1_ref, be1_ref, w1_ref, fb1_ref, w2_ref, fb2_ref,
                    g2_ref, be2_ref, o_ref, x_vmem, *, num_heads, eps):
    layer = pl.program_id(1)

    # Layer 0 of each batch element: seed the resident activation from the
    # embeddings block (f32 carry for residual / LayerNorm accuracy).
    @pl.when(layer == 0)
    def _():
        x_vmem[...] = x_emb_ref[...].astype(jnp.float32)

    x = x_vmem[...]                                       # (S, H) f32
    S, H = x.shape
    dh = H // num_heads
    scale = 1.0 / (dh ** 0.5)

    # ---------------- Multi-head self-attention ----------------
    # Fused QKV: one (S,H)x(H,3H) MXU pass + one bias add.
    qkv = jnp.dot(x.astype(wqkv_ref.dtype), wqkv_ref[...],
                  preferred_element_type=jnp.float32) + bqkv_ref[...]   # (S, 3H)

    def split_heads(mat):                                  # (S, H) -> (nh, S, dh)
        return jnp.stack(
            [mat[:, h * dh:(h + 1) * dh] for h in range(num_heads)], axis=0)

    q3 = split_heads(qkv[:, 0 * H:1 * H])
    k3 = split_heads(qkv[:, 1 * H:2 * H])
    v3 = split_heads(qkv[:, 2 * H:3 * H])

    # Batched scores for all heads (same pattern as the reference flash kernel).
    scores = jnp.einsum("hqd,hkd->hqk", q3, k3,
                        preferred_element_type=jnp.float32) * scale     # (nh,S,S)
    mask_bias = (mask_ref[...].astype(jnp.float32) - 1.0) * 1e9         # (1, S)
    scores = scores + mask_bias.reshape(1, 1, S)

    mx = jnp.max(scores, axis=-1, keepdims=True)
    ex = jnp.exp(scores - mx)
    p = ex * pl.reciprocal(jnp.sum(ex, axis=-1, keepdims=True), approx=True)

    ctx = jnp.einsum("hqk,hkd->hqd", p, v3,
                     preferred_element_type=jnp.float32)                # (nh,S,dh)
    # Merge heads back to lanes, then ONE full-depth output projection.
    ctx2 = jnp.concatenate([ctx[h] for h in range(num_heads)], axis=-1)  # (S, H)
    attn = jnp.dot(ctx2.astype(wo_ref.dtype), wo_ref[...],
                   preferred_element_type=jnp.float32) + bo_ref[...]

    # SubLayer 1: LayerNorm(x + dropout(attn)); dropout = identity (eval).
    r1 = x + attn
    mu1 = jnp.mean(r1, axis=-1, keepdims=True)
    c1 = r1 - mu1
    var1 = jnp.mean(c1 * c1, axis=-1, keepdims=True)
    x1 = c1 * jax.lax.rsqrt(var1 + eps) * g1_ref[...] + be1_ref[...]

    # ---------------- Feed-forward ----------------
    # TODO(synk): FeedForward activation assumed ReLU (exact definition not given).
    ff = jnp.dot(x1.astype(w1_ref.dtype), w1_ref[...],
                 preferred_element_type=jnp.float32) + fb1_ref[...]
    ff = jnp.maximum(ff, 0.0)
    y = jnp.dot(ff.astype(w2_ref.dtype), w2_ref[...],
                preferred_element_type=jnp.float32) + fb2_ref[...]

    # SubLayer 2: LayerNorm(x1 + dropout(y))
    r2 = x1 + y
    mu2 = jnp.mean(r2, axis=-1, keepdims=True)
    c2 = r2 - mu2
    var2 = jnp.mean(c2 * c2, axis=-1, keepdims=True)
    x2 = c2 * jax.lax.rsqrt(var2 + eps) * g2_ref[...] + be2_ref[...]

    # Carry the activation in VMEM to the next layer; write HBM output once.
    x_vmem[...] = x2

    @pl.when(layer == pl.num_programs(1) - 1)
    def _():
        o_ref[...] = x2.astype(o_ref.dtype)


def _encoder_stack(x_emb, mask, params, *, num_heads, eps):
    B, S, H = x_emb.shape
    L = params["wqkv"].shape[0]
    dff = params["w1"].shape[-1]
    kernel = functools.partial(_encoder_kernel, num_heads=num_heads, eps=eps)

    per_b = lambda b, l: (b, 0, 0)     # batch-indexed blocks (constant across L)
    per_l = lambda b, l: (l, 0, 0)     # layer-indexed weights (pipelined over L)

    return pl.pallas_call(
        kernel,
        out_shape=jax.ShapeDtypeStruct((B, S, H), x_emb.dtype),
        grid_spec=pltpu.PrefetchScalarGridSpec(
            num_scalar_prefetch=0,
            grid=(B, L),                      # L innermost: activation stays resident
            in_specs=[
                pl.BlockSpec((None, S, H), per_b),          # embeddings (layer-0 seed)
                pl.BlockSpec((None, 1, S), per_b),          # attention mask
                pl.BlockSpec((None, H, 3 * H), per_l),      # fused Wqkv
                pl.BlockSpec((None, 1, 3 * H), per_l),      # fused qkv bias
                pl.BlockSpec((None, H, H), per_l),          # Wo
                pl.BlockSpec((None, 1, H), per_l),          # bo
                pl.BlockSpec((None, 1, H), per_l),          # LN1 gamma
                pl.BlockSpec((None, 1, H), per_l),          # LN1 beta
                pl.BlockSpec((None, H, dff), per_l),        # W1
                pl.BlockSpec((None, 1, dff), per_l),        # b1
                pl.BlockSpec((None, dff, H), per_l),        # W2
                pl.BlockSpec((None, 1, H), per_l),          # b2
                pl.BlockSpec((None, 1, H), per_l),          # LN2 gamma
                pl.BlockSpec((None, 1, H), per_l),          # LN2 beta
            ],
            out_specs=pl.BlockSpec((None, S, H), per_b),
            scratch_shapes=[pltpu.VMEM((S, H), jnp.float32)],   # resident activation
        ),
        compiler_params=pltpu.CompilerParams(
            dimension_semantics=("parallel", "arbitrary")),
    )(x_emb, mask, params["wqkv"], params["bqkv"], params["wo"], params["bo"],
      params["ln1_g"], params["ln1_b"], params["w1"], params["b1"],
      params["w2"], params["b2"], params["ln2_g"], params["ln2_b"])


# ---------------------------------------------------------------------------
# Full model wrapper
# ---------------------------------------------------------------------------
def encoder_only_transformer(input_ids, attention_mask, params, *, num_heads,
                             eps=1e-5):
    """input_ids: (B, S) int32; attention_mask: (B, 1, S) float (1=keep, 0=mask)."""
    # TODO(synk): TransformerEmbedding details unspecified; assumed learned token
    # + learned positional embeddings (no embedding LayerNorm / scaling).
    x = _embed(input_ids, params["tok_emb"], params["pos_emb"])
    return _encoder_stack(x, attention_mask, params, num_heads=num_heads, eps=eps)


# ---------------------------------------------------------------------------
# Plain-JAX reference (same math) for sanity checking
# ---------------------------------------------------------------------------
def _layer_norm_ref(x, g, b, eps):
    mu = x.mean(-1, keepdims=True)
    var = ((x - mu) ** 2).mean(-1, keepdims=True)
    return (x - mu) * jax.lax.rsqrt(var + eps) * g + b


def _reference(input_ids, mask, params, *, num_heads, eps=1e-5):
    tok = jnp.take(params["tok_emb"], input_ids, axis=0)      # (B, S, H)
    x = tok + params["pos_emb"][None, :, :]
    B, S, H = x.shape
    dh = H // num_heads
    L = params["wqkv"].shape[0]
    bias = ((mask - 1.0) * 1e9)[:, None, :, :]                # (B, 1, 1, S)
    for l in range(L):
        qkv = x @ params["wqkv"][l] + params["bqkv"][l]
        q, k, v = jnp.split(qkv, 3, axis=-1)
        q = q.reshape(B, S, num_heads, dh).transpose(0, 2, 1, 3)
        k = k.reshape(B, S, num_heads, dh).transpose(0, 2, 1, 3)
        v = v.reshape(B, S, num_heads, dh).transpose(0, 2, 1, 3)
        scores = jnp.einsum("bhqd,bhkd->bhqk", q, k) / (dh ** 0.5) + bias
        p = jax.nn.softmax(scores, axis=-1)
        ctx = jnp.einsum("bhqk,bhkd->bhqd", p, v).transpose(0, 2, 1, 3)
        ctx = ctx.reshape(B, S, H)
        attn = ctx @ params["wo"][l] + params["bo"][l]
        x = _layer_norm_ref(x + attn, params["ln1_g"][l], params["ln1_b"][l], eps)
        ff = jnp.maximum(x @ params["w1"][l] + params["b1"][l], 0.0)
        y = ff @ params["w2"][l] + params["b2"][l]
        x = _layer_norm_ref(x + y, params["ln2_g"][l], params["ln2_b"][l], eps)
    return x


# ---------------------------------------------------------------------------
# Parameter init (per-layer weights stacked into (L, ...) arrays)
# ---------------------------------------------------------------------------
def init_params(key, *, vocab, seq, hidden, num_heads, dff, num_layers,
                dtype=jnp.float32):
    def dense(k, shape, scale=0.05):
        return (scale * jax.random.normal(k, shape)).astype(dtype)

    keys = jax.random.split(key, 2 + num_layers)
    acc = {name: [] for name in
           ["wqkv", "bqkv", "wo", "bo", "ln1_g", "ln1_b",
            "w1", "b1", "w2", "b2", "ln2_g", "ln2_b"]}
    for i in range(num_layers):
        lk = jax.random.split(keys[2 + i], 14)
        wq = dense(lk[0], (hidden, hidden))
        wk = dense(lk[1], (hidden, hidden))
        wv = dense(lk[2], (hidden, hidden))
        acc["wqkv"].append(jnp.concatenate([wq, wk, wv], axis=1))     # (H, 3H)
        acc["bqkv"].append(dense(lk[3], (1, 3 * hidden), 0.02))
        acc["wo"].append(dense(lk[4], (hidden, hidden)))
        acc["bo"].append(dense(lk[5], (1, hidden), 0.02))
        acc["ln1_g"].append(1.0 + dense(lk[6], (1, hidden), 0.05))
        acc["ln1_b"].append(dense(lk[7], (1, hidden), 0.02))
        acc["w1"].append(dense(lk[8], (hidden, dff)))
        acc["b1"].append(dense(lk[9], (1, dff), 0.02))
        acc["w2"].append(dense(lk[10], (dff, hidden)))
        acc["b2"].append(dense(lk[11], (1, hidden), 0.02))
        acc["ln2_g"].append(1.0 + dense(lk[12], (1, hidden), 0.05))
        acc["ln2_b"].append(dense(lk[13], (1, hidden), 0.02))

    params = {name: jnp.stack(vals, axis=0) for name, vals in acc.items()}
    params["tok_emb"] = dense(keys[0], (vocab, hidden), 0.5)
    params["pos_emb"] = dense(keys[1], (seq, hidden), 0.5)
    return params


if __name__ == "__main__":
    B, S, H = 2, 8, 32
    NUM_HEADS, D_FF, VOCAB, NUM_LAYERS = 4, 128, 64, 2

    root = jax.random.PRNGKey(0)
    k_ids, k_params = jax.random.split(root)

    input_ids = jax.random.randint(k_ids, (B, S), 0, VOCAB, dtype=jnp.int32)

    # attention mask: (B, 1, S); batch 0 attends everywhere, batch 1 masks the
    # last two key positions (as padding).
    attention_mask = jnp.ones((B, 1, S), dtype=jnp.float32)
    attention_mask = attention_mask.at[1, 0, S - 2:].set(0.0)

    params = init_params(k_params, vocab=VOCAB, seq=S, hidden=H,
                         num_heads=NUM_HEADS, dff=D_FF, num_layers=NUM_LAYERS)

    out = encoder_only_transformer(input_ids, attention_mask, params,
                                   num_heads=NUM_HEADS)
    out = jax.block_until_ready(out)

    ref = _reference(input_ids, attention_mask, params, num_heads=NUM_HEADS)
    assert out.shape == (B, S, H)
    assert bool(jnp.all(jnp.isfinite(out)))
    max_err = float(jnp.max(jnp.abs(out - ref)))
    assert jnp.allclose(out, ref, rtol=2e-2, atol=2e-2), (
        "mismatch vs reference: max abs err = %e" % max_err)

    # TODO(synk): dropout is identity (eval mode); training-mode dropout would
    # use pltpu.prng_seed / pltpu.prng_random_bits inside the kernels.
    print("KERNEL_OK")
</pallas_src>

<mosaic_0001>
module attributes {stable_mosaic.version = 11 : i64} {
  func.func @_embed_kernel(%arg0: i32, %arg1: memref<16xi32, #tpu.memory_space<smem>>, %arg2: memref<1x1x32xf32, #tpu.memory_space<vmem>>, %arg3: memref<1x1x32xf32, #tpu.memory_space<vmem>>, %arg4: memref<1x1x32xf32, #tpu.memory_space<vmem>>) attributes {dimension_semantics = [#tpu.dimension_semantics<arbitrary>], iteration_bounds = array<i64: 16>, scalar_prefetch = 1 : i64, scratch_operands = 0 : i64, tpu.core_type = #tpu.core_type<tc>, window_params = [{transform_indices = @transform_0, window_bounds = array<i64: 1, 1, 32>}, {transform_indices = @transform_1, window_bounds = array<i64: 1, 1, 32>}, {transform_indices = @transform_2, window_bounds = array<i64: 1, 1, 32>}]} {
    %c0 = arith.constant 0 : index
    %c0_0 = arith.constant 0 : index
    %c0_1 = arith.constant 0 : index
    %0 = vector.load %arg2[%c0, %c0_0, %c0_1] : memref<1x1x32xf32, #tpu.memory_space<vmem>>, vector<1x1x32xf32>
    %1 = vector.shape_cast %0 : vector<1x1x32xf32> to vector<1x32xf32>
    %c0_2 = arith.constant 0 : index
    %c0_3 = arith.constant 0 : index
    %c0_4 = arith.constant 0 : index
    %2 = vector.load %arg3[%c0_2, %c0_3, %c0_4] : memref<1x1x32xf32, #tpu.memory_space<vmem>>, vector<1x1x32xf32>
    %3 = vector.shape_cast %2 : vector<1x1x32xf32> to vector<1x32xf32>
    %4 = arith.addf %1, %3 : vector<1x32xf32>
    %c0_5 = arith.constant 0 : index
    %c0_6 = arith.constant 0 : index
    %c0_7 = arith.constant 0 : index
    %5 = vector.load %arg4[%c0_5, %c0_6, %c0_7] : memref<1x1x32xf32, #tpu.memory_space<vmem>>, vector<1x1x32xf32>
    %6 = vector.shape_cast %5 : vector<1x1x32xf32> to vector<1x32xf32>
    %7 = vector.shape_cast %4 : vector<1x32xf32> to vector<1x1x32xf32>
    tpu.vector_store %arg4[%c0_5, %c0_6, %c0_7], %7 {strides = array<i32>} : memref<1x1x32xf32, #tpu.memory_space<vmem>>, vector<1x1x32xf32>,
    return
  }
  func.func @transform_0(%arg0: i32, %arg1: memref<16xi32, #tpu.memory_space<smem>>) -> (i32, i32, i32) {
    %0 = arith.index_cast %arg0 : i32 to index
    %1 = memref.load %arg1[%0] : memref<16xi32, #tpu.memory_space<smem>>
    %c0_i32 = arith.constant 0 : i32
    %c0_i32_0 = arith.constant 0 : i32
    %c0_i32_1 = arith.constant 0 : i32
    return %1, %c0_i32, %c0_i32_0 : i32, i32, i32
  }
  func.func @transform_1(%arg0: i32, %arg1: memref<16xi32, #tpu.memory_space<smem>>) -> (i32, i32, i32) {
    %c8_i32 = arith.constant 8 : i32
    %c0_i32 = arith.constant 0 : i32
    %0 = arith.cmpi eq, %c8_i32, %c0_i32 : i32
    %c1_i32 = arith.constant 1 : i32
    %1 = arith.select %0, %c1_i32, %c8_i32 : i32
    %2 = arith.remsi %arg0, %1 : i32
    %c0_i32_0 = arith.constant 0 : i32
    %3 = arith.cmpi ne, %2, %c0_i32_0 : i32
    %c0_i32_1 = arith.constant 0 : i32
    %4 = arith.cmpi slt, %2, %c0_i32_1 : i32
    %c0_i32_2 = arith.constant 0 : i32
    %5 = arith.cmpi slt, %1, %c0_i32_2 : i32
    %6 = arith.xori %4, %5 : i1
    %7 = arith.andi %6, %3 : i1
    %8 = arith.addi %2, %1 : i32
    %9 = arith.select %7, %8, %2 : i32
    %c0_i32_3 = arith.constant 0 : i32
    %c0_i32_4 = arith.constant 0 : i32
    %c0_i32_5 = arith.constant 0 : i32
    return %9, %c0_i32_3, %c0_i32_4 : i32, i32, i32
  }
  func.func @transform_2(%arg0: i32, %arg1: memref<16xi32, #tpu.memory_space<smem>>) -> (i32, i32, i32) {
    %c0_i32 = arith.constant 0 : i32
    %c0_i32_0 = arith.constant 0 : i32
    %c0_i32_1 = arith.constant 0 : i32
    return %arg0, %c0_i32, %c0_i32_0 : i32, i32, i32
  }
}

</mosaic_0001>

<bundles_post_ra>
// kernel: tpu_custom_call.1
= control target key start
LH: loop header
LB: loop body
LE: loop exit
PB: predicated region body
PF: predicated region fallthrough
CT: control target
= control target key end

     0   :  { %s590_s0 = inlined_call_operand.vmem [shape: s32[16], index: 0, kind: input, shape index: {}]   ;;  %s591_s1 = inlined_call_operand.vmem [shape: f32[64,1,32], index: 1, kind: input, shape index: {}]   ;;  %s592_s2 = inlined_call_operand.vmem [shape: f32[8,1,32], index: 2, kind: input, shape index: {}]   ;;  %s593_s3 = inlined_call_operand.hbm [shape: f32[16,1,32], index: 3, kind: output, shape index: {}]  }
   0x1   :  { %s8_s14 = sshll.u32 %s590_s0, 4  ;;  %s9_s14 = int_to_ptr.vmem [resolvable:$true] %s8_s14 }
   0x2   :  { %s382_s15 = scalar_lea.vmem %s9_s14, 16  ;;  %p387_p1 = scmp.lt.s32.totalorder %s9_s14, %s9_s14 }
   0x3   :  { %p383_p0 = scmp.ne.s32.totalorder %s9_s14, %s382_s15  ;;  %p388_p2 = scmp.lt.s32.totalorder %s382_s15, %s382_s15 }
   0x5   :  { %p389_p3 = por %p388_p2, %p387_p1 }
   0x7   :  { %p390_p4 = pnand %p389_p3, %p383_p0 }
   0x9   :  { %393 = shalt.err (!%p390_p4)  }
   0xa   :  { %s460_s16 = smov [#allocation3]  }
   0xb   :  { %11 = dma.vmem_to_smem %s9_s14, 16, %s460_s16, [#allocation2] }
   0xc   :  { %438 = dma.done.wait [#allocation2], 16 }
   0xd   :  { %439 = vsyncadd [#allocation2], 4294967280 }
   0xe   :  { %13 = sfence }
   0xf   :  { %14 = vsyncpa [#allocation5], 0 }
  0x10   :  { %16 = vsyncpa [#allocation5 + $0x1], 0  ;;  %s485_s17 = smov 0   ;;  %s487_s18 = smov 0  }
  0x11   :  { %s489_s0 = smov 0   ;;  %s491_s19 = smov 0  }
  0x12 LB: > { %s506_s20 = sadd.s32 4294967295, %s458_s19   ;;  %s326_s21 = sadd.s32 4294967294, %s458_s19   ;;  %s458_s19 = sphi %s491_s19, %s599_s19   ;;  %s454_s0 = sphi %s489_s0, %s598_s0   ;;  %s450_s18 = sphi %s487_s18, %s597_s18   ;;  %s446_s17 = sphi %s485_s17, %s596_s17  }
  0x13   : > { %s510_s22 = sadd.s32 1, %s458_s19   ;;  %s107_s23 = sadd.s32 1, %s454_s0 }
  0x14   : > { %s104_s24 = ssub.s32 %s458_s19, %s510_s22  ;;  %p117_p5 = scmp.ne.s32.totalorder %s454_s0, %s450_s18 }
  0x15   : > { %p105_p6 = scmp.eq.s32.totalorder %s104_s24, 0  ;;  %p118_p7 = scmp.eq.s32.totalorder %s506_s20, 15 }
  0x16   : > { %p123_p8 = scmp.ne.s32.totalorder %s450_s18, %s446_s17  ;;  %p124_p9 = scmp.eq.s32.totalorder %s326_s21, 15 }
  0x17   : > { %s521_s25 = scalar_select %p105_p6, %s454_s0, %s107_s23  }
  0x18   : > { %p523_p10 = por %p118_p7, %p117_p5  ;;  %p527_p11 = por %p124_p9, %p123_p8 }
  0x19   : > { %p335_p12 = scmp.ge.s32.totalorder %s458_s19, 1  ;;  %p180_p13 = scmp.lt.s32.totalorder %s458_s19, 17 }
  0x1b   : > { %p181_p0 = pnand %p335_p12, %p180_p13 }
  0x1c   : > { %s215_s28 = sld [smem:[#allocation3 + %s506_s20]] (!%p181_p0)  ;;  %s221_s29 = ssub.s32 (!%p181_p0), 0, %s506_s20  ;;  %vm250_vm0 = vcmask (!%p181_p0), 253952  }
  0x1d   : > { %184 = sbr.rel (%p181_p0) target bundleno = 62 (0x3e), region = 28  ;;  %p220_p1 = scmp.lt.s32.totalorder (!%p181_p0), %s506_s20, 0 }
  0x1e   : > { %s336_s30 = smin.u32 (!%p181_p0), %s506_s20, %s221_s29  ;;  %s213_s6 = sand.u32 (!%p181_p0), 1, %s450_s18  }
  0x1f   : > { %s223_s4 = sand.u32 (!%p181_p0), 7, %s336_s30   ;;  %s214_s11 = scalar_lea.vmem (!%p181_p0), [#allocation4], %s213_s6 }
  0x20   : > { %s224_s5 = ssub.s32 (!%p181_p0), 0, %s223_s4  ;;  %s265_s12 = sshll.u32 (!%p181_p0), %s214_s11, 4  ;;  %s545_s12 = int_to_ptr.vmem [resolvable:$true] %s265_s12 }
  0x21   : > { %s339_s13 = sshll.u32 (!%p181_p0), %s506_s20, 4  ;;  %s394_s20 = scalar_lea.vmem (!%p181_p0), %s545_s12, 16 }
  0x22   : > { %p216_p2 = scmp.lt.s32.totalorder (!%p181_p0), %s215_s28, 63  ;;  %s550_s24 = scalar_lea.hbm (!%p181_p0), %s593_s3, %s339_s13 }
  0x23   : > { %p395_p5 = scmp.ne.s32.totalorder (!%p181_p0), %s545_s12, %s394_s20  ;;  %s461_s29 = smov (!%p181_p0), [#allocation4]  }
  0x24   : > { %s601_s5 = smov (!%p220_p1, %s224_s5), %s223_s4  ;;  %s603_s28 = smov (!%p216_p2, %s215_s28), 63 }
  0x25   : > { %p338_p3 = scmp.lt.s32.totalorder %s601_s5, 0  ;;  %s230_s7 = sadd.s32 8, %s601_s5 }
  0x26   : > { %s218_s10 = scalar_lea.vmem %s591_s1, %s603_s28  ;;  %s253_s28 = scalar_lea.sflag [#allocation5], %s213_s6 }
  0x27   : > { %s605_s7 = smov (!%p338_p3, %s230_s7), %s601_s5  ;;  %v247_v0 = vld [vmem:[%s218_s10] sm:$0x1]  ;;  %p396_p6 = pnand %p395_p5, %p523_p10 }
  0x28   : > { %p232_p4 = scmp.lt.s32.totalorder %s605_s7, 7  ;;  %s398_s30 = sshll.u32 %s461_s29, 4  ;;  %s399_s30 = int_to_ptr.vmem [resolvable:$false] %s398_s30 }
  0x29   : > { %p397_p7 = pneg %p396_p6  ;;  %s400_s4 = scalar_lea.vmem %s399_s30, 32 }
  0x2a   : > { %s607_s7 = smov (!%p232_p4, %s605_s7), 7  ;;  %p401_p8 = scmp.lt.s32.totalorder %s545_s12, %s399_s30 }
  0x2b   : > { %s234_s16 = scalar_lea.vmem %s592_s2, %s607_s7  ;;  %p402_p9 = scmp.lt.s32.totalorder %s400_s4, %s394_s20 }
  0x2c   : > { %v248_v1 = vld [vmem:[%s234_s16] sm:$0x1] }
  0x2d   : > { %v249_v2 = vadd.f32 %v248_v1, %v247_v0  ;;  %p403_p12 = por %p402_p9, %p401_p8 }
  0x2f   : > { %251 = vst.msk [vmem:[%s214_s11] sm:$0x1] %vm250_vm0, %v249_v2  ;;  %p404_p13 = pnand %p403_p12, %p397_p7 }
  0x31   : > { %407 = shalt.err (!%p404_p13)
}
  0x32   : > { %s408_s5 = scalar_lea.hbm %s550_s24, 16  ;;  %s412_s8 = scalar_lea.hbm %s593_s3, 256 }
  0x33   : > { %p409_p0 = scmp.ne.s32.totalorder %s550_s24, %s408_s5  ;;  %p413_p3 = scmp.lt.u32.totalorder %s550_s24, %s593_s3 }
  0x34   : > { %p414_p4 = scmp.lt.u32.totalorder %s412_s8, %s408_s5  ;;  %p416_p6 = scmp.lt.u32.totalorder %s408_s5, %s550_s24 }
  0x35   : > { %p410_p1 = pnand %p409_p0, %p523_p10 }
  0x36   : > { %p415_p5 = por %p414_p4, %p413_p3 }
  0x37   : > { %p411_p2 = pneg %p410_p1 }
  0x38   : > { %p417_p7 = por %p416_p6, %p415_p5 }
  0x3a   : > { %p418_p8 = pnand %p417_p7, %p411_p2 }
  0x3c   : > { %421 = shalt.err (!%p418_p8)
}
  0x3d   : > { %342 = dma.vmem_to_hbm [thread:$0]  (%p523_p10), %s545_s12, 16, %s550_s24, %s253_s28  }
  0x3e PF: > { %p348_p9 = scmp.ge.s32.totalorder %s458_s19, 2  ;;  %s277_s11 = sand.u32 1, %s446_s17  }
  0x3f   : > { %s278_s13 = scalar_lea.sflag [#allocation5], %s277_s11 }
  0x40   : > { %p345_p12 = pnand %p348_p9, %p527_p11 }
  0x42   : > { %441 = dma.done.wait (!%p345_p12), %s278_s13, 16  }
  0x43   : > { %443 = vsyncadd (!%p345_p12), %s278_s13, 4294967280  ;;  %p19_p13 = scmp.ge.s32.totalorder %s510_s22, 18   ;;  %s596_s17 = smov %s450_s18 }
  0x44   : > { %s597_s18 = smov %s454_s0  ;;  %s598_s0 = smov %s521_s25 }
  0x45   : > { %s599_s19 = smov %s510_s22  ;;  %21 = sbr.rel (!%p19_p13) target bundleno = 18 (0x12), region = 66 }
  0x4c   :  { %282 = vsyncpa [#allocation5], 1 }
  0x4d   :  { %284 = vsyncpa [#allocation5 + $0x1], 1 }

</bundles_post_ra>
